<compile_context>
chip_gen: v5e
topology: v5e:2x2
jax: 0.10.0
libtpu: 0.0.40
codegen_flags: <defaults>
</compile_context>

<pallas_src>
import functools
import math

import jax
import jax.numpy as jnp
from jax.experimental import pallas as pl
from jax.experimental.pallas import tpu as pltpu

# bf16 operands are MXU-native on v5e/v6e/v7x; accumulation stays f32.
MATMUL_DTYPE = jnp.bfloat16


# --------------------------------------------------------------------------------------
# Device-dependent budgets / small helpers
# --------------------------------------------------------------------------------------
@functools.lru_cache(maxsize=None)
def _vmem_limit_bytes():
    """~85% of physical VMEM, capped at 112 MiB: ≈54 MiB on v7x, ≈108 MiB on v5e/v6e."""
    try:
        cap = pltpu.get_tpu_info().vmem_capacity_bytes
        return int(min(cap * 0.85, 112 * 1024 * 1024))
    except Exception:
        return 56 * 1024 * 1024  # safe on every generation


def _row_tile_cap():
    return 512 if _vmem_limit_bytes() > 64 * 1024 * 1024 else 256


def _hidden_tile_cap():
    return 1024 if _vmem_limit_bytes() > 64 * 1024 * 1024 else 512


def _round_up(x, m):
    return ((x + m - 1) // m) * m


def _pick_divisor_tile(dim, unit, cap):
    """Largest divisor of `dim` that is a multiple of `unit` and <= cap."""
    t = min(dim, cap)
    t -= t % unit
    while t >= unit:
        if dim % t == 0:
            return t
        t -= unit
    # TODO(synk): pad + mask the tail instead of falling back to the full extent.
    return dim


@functools.lru_cache(maxsize=None)
def _buffered_one_supported():
    """Probe whether pl.Buffered(1) (single-buffered constant-index blocks) works here."""
    try:
        buf = pl.Buffered(1)

        def k(x_ref, o_ref):
            o_ref[...] = x_ref[...] * 2.0

        f = pl.pallas_call(
            k,
            out_shape=jax.ShapeDtypeStruct((8, 128), jnp.float32),
            grid=(1,),
            in_specs=[pl.BlockSpec((8, 128), lambda i: (0, 0), pipeline_mode=buf)],
            out_specs=pl.BlockSpec((8, 128), lambda i: (0, 0)),
        )
        y = jax.block_until_ready(f(jnp.ones((8, 128), jnp.float32)))
        return bool(jnp.allclose(y, 2.0))
    except Exception:
        return False


def _const_spec(shape):
    """BlockSpec for blocks whose index never changes (weights/biases/LN params).
    Single-buffered when supported -> no pointless double-buffering of weights."""
    nd = len(shape)
    idx = lambda *args: (0,) * nd
    if _buffered_one_supported():
        return pl.BlockSpec(shape, idx, pipeline_mode=pl.Buffered(1))
    return pl.BlockSpec(shape, idx)


def _mm(a, b):
    """MXU matmul, bf16 operands, f32 accumulation."""
    return jnp.dot(a.astype(MATMUL_DTYPE), b.astype(MATMUL_DTYPE),
                   preferred_element_type=jnp.float32)


def _qk(a, b):
    """Contract the last dims of both operands (q @ k^T) without an explicit transpose."""
    return jax.lax.dot_general(
        a.astype(MATMUL_DTYPE), b.astype(MATMUL_DTYPE),
        dimension_numbers=(((1,), (1,)), ((), ())),
        preferred_element_type=jnp.float32)


# --------------------------------------------------------------------------------------
# Kernel 1: LN1 + fused Q/K/V projections (1/sqrt(D) pre-folded into Q weights & bias)
# --------------------------------------------------------------------------------------
def _qkv_kernel(x_ref, g_ref, b_ref, wq_ref, bq_ref, wk_ref, bk_ref, wv_ref, bv_ref,
                q_ref, k_ref, v_ref):
    x = x_ref[...]                                            # (TR, E) f32
    mu = jnp.mean(x, axis=-1, keepdims=True)
    var = jnp.mean((x - mu) ** 2, axis=-1, keepdims=True)
    xn = (x - mu) * jax.lax.rsqrt(var + 1e-5) * g_ref[0] + b_ref[0]   # LayerNorm1, eps=1e-5
    q_ref[...] = (_mm(xn, wq_ref[...]) + bq_ref[0]).astype(q_ref.dtype)
    k_ref[...] = (_mm(xn, wk_ref[...]) + bk_ref[0]).astype(k_ref.dtype)
    v_ref[...] = (_mm(xn, wv_ref[...]) + bv_ref[0]).astype(v_ref.dtype)


def qkv_projection(x2d, p):
    """x2d: (R, E) f32 -> q, k, v each (R, E) bf16."""
    R, E = x2d.shape
    TR = min(_row_tile_cap(), _round_up(R, 8))
    Rp = _round_up(R, TR)
    xp = x2d if Rp == R else jnp.pad(x2d, ((0, Rp - R), (0, 0)))  # padded tail, dropped below

    row = pl.BlockSpec((TR, E), lambda r: (r, 0))
    # TODO(synk): for very large E, tile the (E, E) projection weights over output columns.
    q, k, v = pl.pallas_call(
        _qkv_kernel,
        out_shape=tuple(jax.ShapeDtypeStruct((Rp, E), jnp.bfloat16) for _ in range(3)),
        grid=(Rp // TR,),
        in_specs=[row,
                  _const_spec((1, E)), _const_spec((1, E)),      # LN1 gamma / beta
                  _const_spec((E, E)), _const_spec((1, E)),      # Wq (pre-T, pre-scaled) / bq
                  _const_spec((E, E)), _const_spec((1, E)),      # Wk / bk
                  _const_spec((E, E)), _const_spec((1, E))],     # Wv / bv
        out_specs=(row, row, row),
        compiler_params=pltpu.CompilerParams(
            dimension_semantics=("parallel",),
            vmem_limit_bytes=_vmem_limit_bytes()),
    )(xp, p["ln1_g"], p["ln1_b"], p["wq_t"], p["bq"], p["wk_t"], p["bk"], p["wv_t"], p["bv"])

    if Rp != R:
        q, k, v = q[:R], k[:R], v[:R]
    return q, k, v


# --------------------------------------------------------------------------------------
# Kernel 2: flash-style attention, grid (N, S//TQ, S//TK), online softmax per head
# --------------------------------------------------------------------------------------
def _make_flash_kernel(num_heads, emb_dim):
    H, E = num_heads, emb_dim
    D = E // H

    def kernel(q_ref, k_ref, v_ref, mask_ref, o_ref, m_s, l_s, acc_s):
        ki = pl.program_id(2)

        @pl.when(ki == 0)
        def _():
            m_s[...] = jnp.full_like(m_s, -jnp.inf)
            l_s[...] = jnp.zeros_like(l_s)
            acc_s[...] = jnp.zeros_like(acc_s)

        q = q_ref[0]          # (TQ, E) bf16 (Q already scaled by 1/sqrt(D) via weights)
        k = k_ref[0]          # (TK, E) bf16
        v = v_ref[0]          # (TK, E) bf16
        mask = mask_ref[0]    # (TQ, TK) f32 additive mask (same for every head)

        for h in range(H):
            sl = slice(h * D, (h + 1) * D)
            s = _qk(q[:, sl], k[:, sl]) + mask                  # (TQ, TK) f32
            m_prev = m_s[h]                                     # (TQ, 1)
            m_new = jnp.maximum(m_prev, jnp.max(s, axis=-1, keepdims=True))
            alpha = jnp.exp(m_prev - m_new)
            p = jnp.exp(s - m_new)                              # f32 exp (v5e-safe)
            l_s[h] = alpha * l_s[h] + jnp.sum(p, axis=-1, keepdims=True)
            acc_s[:, sl] = alpha * acc_s[:, sl] + _mm(p, v[:, sl])
            m_s[h] = m_new

        @pl.when(ki == pl.num_programs(2) - 1)
        def _():
            for h in range(H):
                sl = slice(h * D, (h + 1) * D)
                l = l_s[h]
                r = pl.reciprocal(l, approx=True)               # EUP slot, off the VALU
                r = r * (2.0 - l * r)                           # one Newton step -> ~f32 exact
                acc_s[:, sl] = acc_s[:, sl] * r
            o_ref[0] = acc_s[...].astype(o_ref.dtype)           # one lane-dense (TQ, E) store

    return kernel


def flash_attention(q, k, v, mask, num_heads):
    """q,k,v: (N, S, E) bf16; mask: (N, S, S) f32 -> context (N, S, E) bf16."""
    N, S, E = q.shape
    H = num_heads
    TQ = _pick_divisor_tile(S, 8, 256)
    TK = _pick_divisor_tile(S, 128, 512)

    return pl.pallas_call(
        _make_flash_kernel(H, E),
        out_shape=jax.ShapeDtypeStruct((N, S, E), jnp.bfloat16),
        grid=(N, S // TQ, S // TK),
        in_specs=[pl.BlockSpec((1, TQ, E), lambda n, qi, ki: (n, qi, 0)),
                  pl.BlockSpec((1, TK, E), lambda n, qi, ki: (n, ki, 0)),
                  pl.BlockSpec((1, TK, E), lambda n, qi, ki: (n, ki, 0)),
                  pl.BlockSpec((1, TQ, TK), lambda n, qi, ki: (n, qi, ki))],   # mask tiled q x kv
        out_specs=pl.BlockSpec((1, TQ, E), lambda n, qi, ki: (n, qi, 0)),
        scratch_shapes=[pltpu.VMEM((H, TQ, 1), jnp.float32),   # running max per head
                        pltpu.VMEM((H, TQ, 1), jnp.float32),   # running denom per head
                        pltpu.VMEM((TQ, E), jnp.float32)],     # per-head output columns
        compiler_params=pltpu.CompilerParams(
            dimension_semantics=("parallel", "parallel", "arbitrary"),
            vmem_limit_bytes=_vmem_limit_bytes()),
    )(q, k, v, mask)


# --------------------------------------------------------------------------------------
# Kernel 3: out-projection + residual + LN2 + MLP, fused.
# Grid: (row blocks = parallel, MLP hidden-column blocks = reduction with accumulator).
# --------------------------------------------------------------------------------------
def _mlp_kernel(ctx_ref, x_ref, wo_ref, bo_ref, g_ref, b_ref,
                w1_ref, b1_ref, w2_ref, b2_ref, o_ref, xn_s, acc_s):
    j = pl.program_id(1)

    @pl.when(j == 0)
    def _():
        # x1 = x + out_proj(attn context); computed once per row tile.
        x1 = x_ref[...] + _mm(ctx_ref[...], wo_ref[...]) + bo_ref[0]
        mu = jnp.mean(x1, axis=-1, keepdims=True)
        var = jnp.mean((x1 - mu) ** 2, axis=-1, keepdims=True)
        xn_s[...] = (x1 - mu) * jax.lax.rsqrt(var + 1e-5) * g_ref[0] + b_ref[0]  # LayerNorm2
        acc_s[...] = x1 + b2_ref[0]                         # residual + fc2 bias (added once)

    # Exact partial MLP over this hidden-column block (ReLU is per-unit, fc2 sums over units).
    h1 = jnp.maximum(_mm(xn_s[...], w1_ref[...]) + b1_ref[0], 0.0)
    acc_s[...] += _mm(h1, w2_ref[...])

    @pl.when(j == pl.num_programs(1) - 1)
    def _():
        o_ref[...] = acc_s[...]


def outproj_mlp(ctx2d, x2d, p):
    """ctx2d: (R, E) bf16 attention context, x2d: (R, E) f32 residual -> (R, E) f32."""
    R, E = x2d.shape
    MLP = p["w1_t"].shape[1]
    TR = min(_row_tile_cap(), _round_up(R, 8))
    Rp = _round_up(R, TR)
    TJ = _pick_divisor_tile(MLP, 128, _hidden_tile_cap())
    if Rp != R:
        ctx2d = jnp.pad(ctx2d, ((0, Rp - R), (0, 0)))
        x2d = jnp.pad(x2d, ((0, Rp - R), (0, 0)))

    row = pl.BlockSpec((TR, E), lambda r, j: (r, 0))
    # TODO(synk): for very large E, tile the (E, E) out-projection weight over columns too.
    out = pl.pallas_call(
        _mlp_kernel,
        out_shape=jax.ShapeDtypeStruct((Rp, E), jnp.float32),
        grid=(Rp // TR, MLP // TJ),
        in_specs=[row,                                         # attn context (resident across j)
                  row,                                         # residual x (resident across j)
                  _const_spec((E, E)), _const_spec((1, E)),    # Wo (pre-T) / bo
                  _const_spec((1, E)), _const_spec((1, E)),    # LN2 gamma / beta
                  pl.BlockSpec((E, TJ), lambda r, j: (0, j)),  # fc1 weight column block
                  pl.BlockSpec((1, TJ), lambda r, j: (0, j)),  # fc1 bias block
                  pl.BlockSpec((TJ, E), lambda r, j: (j, 0)),  # fc2 weight row block
                  _const_spec((1, E))],                        # fc2 bias
        out_specs=row,
        scratch_shapes=[pltpu.VMEM((TR, E), jnp.float32),      # LN2 output
                        pltpu.VMEM((TR, E), jnp.float32)],     # accumulator
        compiler_params=pltpu.CompilerParams(
            dimension_semantics=("parallel", "arbitrary"),
            vmem_limit_bytes=_vmem_limit_bytes()),
    )(ctx2d, x2d, p["wo_t"], p["bo"], p["ln2_g"], p["ln2_b"],
      p["w1_t"], p["b1"], p["w2_t"], p["b2"])
    return out[:R] if Rp != R else out


# --------------------------------------------------------------------------------------
# Full transformer forward + params
# --------------------------------------------------------------------------------------
def encoder_layer(x_nse, mask_nss, p):
    N, S, E = x_nse.shape
    x2 = x_nse.reshape(N * S, E)
    q, k, v = qkv_projection(x2, p)
    ctx = flash_attention(q.reshape(N, S, E), k.reshape(N, S, E), v.reshape(N, S, E),
                          mask_nss, p["num_heads"])
    out = outproj_mlp(ctx.reshape(N * S, E), x2, p)
    return out.reshape(N, S, E)


def transformer_forward(x_sne, mask_nss, prepared_params):
    """x_sne: (S, N, E) like the PyTorch module (batch_first=False)."""
    x = jnp.transpose(x_sne, (1, 0, 2))          # -> (N, S, E) kernel layout
    for p in prepared_params:
        x = encoder_layer(x, mask_nss, p)
    return jnp.transpose(x, (1, 0, 2))           # -> (S, N, E)


def init_params(key, emb_dim, mlp_dim, num_layers, num_heads):
    """Synthetic init mirroring the module's parameter shapes.
    All Linear weights are stored PRE-TRANSPOSED (W_t = W.T), so y = x @ W_t + b."""
    params = []
    E, M = emb_dim, mlp_dim
    for i in range(num_layers):
        ks = jax.random.split(jax.random.fold_in(key, i), 4)
        params.append(dict(
            num_heads=num_heads,
            ln1_g=jnp.ones((1, E), jnp.float32),
            ln1_b=jnp.zeros((1, E), jnp.float32),
            wqkv_t=(jax.random.normal(ks[0], (E, 3 * E))
                    * (1.0 / math.sqrt(E))).astype(jnp.float32),
            bqkv=jnp.zeros((1, 3 * E), jnp.float32),
            wo_t=(jax.random.normal(ks[1], (E, E))
                  * (1.0 / math.sqrt(E))).astype(jnp.float32),
            bo=jnp.zeros((1, E), jnp.float32),
            ln2_g=jnp.ones((1, E), jnp.float32),
            ln2_b=jnp.zeros((1, E), jnp.float32),
            w1_t=(jax.random.normal(ks[2], (E, M))
                  * math.sqrt(2.0 / E)).astype(jnp.float32),
            b1=jnp.zeros((1, M), jnp.float32),
            w2_t=(jax.random.normal(ks[3], (M, E))
                  * math.sqrt(2.0 / M)).astype(jnp.float32),
            b2=jnp.zeros((1, E), jnp.float32),
        ))
    return params


def prepare_params(layer_params):
    """One-time weight transform: split the fused QKV weight, fold 1/sqrt(head_dim) into
    the Q weights/bias, and cast all matmul weights to bf16 (biases/LN stay f32)."""
    prepped = []
    for p in layer_params:
        E = p["ln1_g"].shape[-1]
        H = p["num_heads"]
        D = E // H
        scale = jnp.float32(1.0 / math.sqrt(D))
        wqkv, bqkv = p["wqkv_t"], p["bqkv"]
        prepped.append(dict(
            num_heads=H,
            ln1_g=p["ln1_g"], ln1_b=p["ln1_b"],
            ln2_g=p["ln2_g"], ln2_b=p["ln2_b"],
            wq_t=(wqkv[:, :E] * scale).astype(jnp.bfloat16),
            wk_t=wqkv[:, E:2 * E].astype(jnp.bfloat16),
            wv_t=wqkv[:, 2 * E:].astype(jnp.bfloat16),
            bq=bqkv[:, :E] * scale,
            bk=bqkv[:, E:2 * E],
            bv=bqkv[:, 2 * E:],
            wo_t=p["wo_t"].astype(jnp.bfloat16), bo=p["bo"],
            w1_t=p["w1_t"].astype(jnp.bfloat16), b1=p["b1"],
            w2_t=p["w2_t"].astype(jnp.bfloat16), b2=p["b2"],
        ))
    return prepped


# ----- pure-JAX reference (same precision regime: bf16 matmul operands, f32 elsewhere) -----
def _ref_block(x_nse, mask_nss, p):
    H = p["num_heads"]
    N, S, E = x_nse.shape
    D = E // H
    bf = jnp.bfloat16

    def mm(a, w):
        return jnp.dot(a.astype(bf), w.astype(bf), preferred_element_type=jnp.float32)

    def ln(t, g, b):
        mu = t.mean(-1, keepdims=True)
        var = ((t - mu) ** 2).mean(-1, keepdims=True)
        return (t - mu) / jnp.sqrt(var + 1e-5) * g[0] + b[0]

    def r16(t):  # bf16 round-trip matching kernel intermediate storage
        return t.astype(bf).astype(jnp.float32)

    xn = ln(x_nse, p["ln1_g"], p["ln1_b"])
    q = r16(mm(xn, p["wq_t"]) + p["bq"][0])   # 1/sqrt(D) already folded into wq/bq
    k = r16(mm(xn, p["wk_t"]) + p["bk"][0])
    v = r16(mm(xn, p["wv_t"]) + p["bv"][0])

    def heads(t):
        return t.reshape(N, S, H, D).transpose(0, 2, 1, 3)

    qh, kh, vh = heads(q), heads(k), heads(v)
    s = jnp.einsum("nhsd,nhtd->nhst", qh.astype(bf), kh.astype(bf),
                   preferred_element_type=jnp.float32) + mask_nss[:, None]
    a = jax.nn.softmax(s, axis=-1)
    ctx = jnp.einsum("nhst,nhtd->nhsd", a.astype(bf), vh.astype(bf),
                     preferred_element_type=jnp.float32)
    ctx = r16(ctx.transpose(0, 2, 1, 3).reshape(N, S, E))
    x1 = x_nse + mm(ctx, p["wo_t"]) + p["bo"][0]
    x1n = ln(x1, p["ln2_g"], p["ln2_b"])
    h1 = jnp.maximum(mm(x1n, p["w1_t"]) + p["b1"][0], 0.0)
    return x1 + mm(h1, p["w2_t"]) + p["b2"][0]


def _ref_forward(x_sne, mask_nss, prepared_params):
    x = jnp.transpose(x_sne, (1, 0, 2))
    for p in prepared_params:
        x = _ref_block(x, mask_nss, p)
    return jnp.transpose(x, (1, 0, 2))


if __name__ == "__main__":
    S, N, E, MLP, H, L = 8, 2, 32, 64, 2, 2   # seq, batch, emb_dim, mlp_dim, heads, layers

    key = jax.random.PRNGKey(0)
    kx, km, kp = jax.random.split(key, 3)
    x = jax.random.normal(kx, (S, N, E), jnp.float32)
    mask = (jax.random.normal(km, (N, S, S)) * 0.1).astype(jnp.float32)

    raw_params = init_params(kp, E, MLP, L, H)
    params = prepare_params(raw_params)       # one-time: split QKV, fold scale, bf16 weights

    out = transformer_forward(x, mask, params)
    out = jax.block_until_ready(out)
    assert out.shape == (S, N, E)
    assert bool(jnp.all(jnp.isfinite(out)))

    ref = _ref_forward(x, mask, params)
    # Tolerance covers bf16 probability rounding (normalized vs. flash unnormalized),
    # the Newton-refined approximate reciprocal, and matmul re-association across two
    # layers; structural bugs (mask/head/residual errors) are orders of magnitude larger.
    err = float(jnp.max(jnp.abs(out - ref)))
    assert jnp.allclose(out, ref, atol=5e-2, rtol=5e-2), f"mismatch: max abs err {err}"

    print("KERNEL_OK")
</pallas_src>

<mosaic_0001>
module attributes {stable_mosaic.version = 11 : i64} {
  func.func @k(%arg0: i32, %arg1: memref<8x128xf32, #tpu.memory_space<vmem>>, %arg2: memref<8x128xf32, #tpu.memory_space<vmem>>) attributes {dimension_semantics = [#tpu.dimension_semantics<arbitrary>], iteration_bounds = array<i64: 1>, scalar_prefetch = 0 : i64, scratch_operands = 0 : i64, tpu.core_type = #tpu.core_type<tc>, window_params = [{pipeline_mode = #tpu.pipeline_mode<synchronous>, transform_indices = @transform_0, window_bounds = array<i64: 8, 128>}, {pipeline_mode = #tpu.pipeline_mode<synchronous>, transform_indices = @transform_1, window_bounds = array<i64: 8, 128>}]} {
    %c0 = arith.constant 0 : index
    %c0_0 = arith.constant 0 : index
    %0 = vector.load %arg1[%c0, %c0_0] : memref<8x128xf32, #tpu.memory_space<vmem>>, vector<8x128xf32>
    %cst = arith.constant 2.000000e+00 : f32
    %1 = vector.broadcast %cst : f32 to vector<8x128xf32>
    %2 = arith.mulf %0, %1 : vector<8x128xf32>
    %c0_1 = arith.constant 0 : index
    %c0_2 = arith.constant 0 : index
    %3 = vector.load %arg2[%c0_1, %c0_2] : memref<8x128xf32, #tpu.memory_space<vmem>>, vector<8x128xf32>
    tpu.vector_store %arg2[%c0_1, %c0_2], %2 {strides = array<i32>} : memref<8x128xf32, #tpu.memory_space<vmem>>, vector<8x128xf32>,
    return
  }
  func.func @transform_0(%arg0: i32) -> (i32, i32) {
    %c0_i32 = arith.constant 0 : i32
    %c0_i32_0 = arith.constant 0 : i32
    %c0_i32_1 = arith.constant 0 : i32
    return %c0_i32, %c0_i32_0 : i32, i32
  }
  func.func @transform_1(%arg0: i32) -> (i32, i32) {
    %c0_i32 = arith.constant 0 : i32
    %c0_i32_0 = arith.constant 0 : i32
    %c0_i32_1 = arith.constant 0 : i32
    return %c0_i32, %c0_i32_0 : i32, i32
  }
}

module attributes {stable_mosaic.version = 11 : i64} {
  func.func @_qkv_kernel(%arg0: i32, %arg1: memref<16x32xf32, #tpu.memory_space<vmem>>, %arg2: memref<1x32xf32, #tpu.memory_space<vmem>>, %arg3: memref<1x32xf32, #tpu.memory_space<vmem>>, %arg4: memref<32x32xbf16, #tpu.memory_space<vmem>>, %arg5: memref<1x32xf32, #tpu.memory_space<vmem>>, %arg6: memref<32x32xbf16, #tpu.memory_space<vmem>>, %arg7: memref<1x32xf32, #tpu.memory_space<vmem>>, %arg8: memref<32x32xbf16, #tpu.memory_space<vmem>>, %arg9: memref<1x32xf32, #tpu.memory_space<vmem>>, %arg10: memref<16x32xbf16, #tpu.memory_space<vmem>>, %arg11: memref<16x32xbf16, #tpu.memory_space<vmem>>, %arg12: memref<16x32xbf16, #tpu.memory_space<vmem>>) attributes {dimension_semantics = [#tpu.dimension_semantics<parallel>], iteration_bounds = array<i64: 1>, scalar_prefetch = 0 : i64, scratch_operands = 0 : i64, tpu.core_type = #tpu.core_type<tc>, window_params = [{transform_indices = @transform_0, window_bounds = array<i64: 16, 32>}, {pipeline_mode = #tpu.pipeline_mode<synchronous>, transform_indices = @transform_1, window_bounds = array<i64: 1, 32>}, {pipeline_mode = #tpu.pipeline_mode<synchronous>, transform_indices = @transform_2, window_bounds = array<i64: 1, 32>}, {pipeline_mode = #tpu.pipeline_mode<synchronous>, transform_indices = @transform_3, window_bounds = array<i64: 32, 32>}, {pipeline_mode = #tpu.pipeline_mode<synchronous>, transform_indices = @transform_4, window_bounds = array<i64: 1, 32>}, {pipeline_mode = #tpu.pipeline_mode<synchronous>, transform_indices = @transform_5, window_bounds = array<i64: 32, 32>}, {pipeline_mode = #tpu.pipeline_mode<synchronous>, transform_indices = @transform_6, window_bounds = array<i64: 1, 32>}, {pipeline_mode = #tpu.pipeline_mode<synchronous>, transform_indices = @transform_7, window_bounds = array<i64: 32, 32>}, {pipeline_mode = #tpu.pipeline_mode<synchronous>, transform_indices = @transform_8, window_bounds = array<i64: 1, 32>}, {transform_indices = @transform_9, window_bounds = array<i64: 16, 32>}, {transform_indices = @transform_10, window_bounds = array<i64: 16, 32>}, {transform_indices = @transform_11, window_bounds = array<i64: 16, 32>}]} {
    %c0 = arith.constant 0 : index
    %c0_0 = arith.constant 0 : index
    %0 = vector.load %arg1[%c0, %c0_0] : memref<16x32xf32, #tpu.memory_space<vmem>>, vector<16x32xf32>
    %cst = arith.constant dense<0.000000e+00> : vector<16xf32>
    %1 = vector.multi_reduction <add>, %0, %cst [1] : vector<16x32xf32> to vector<16xf32>
    %2 = vector.shape_cast %1 : vector<16xf32> to vector<16x1xf32>
    %cst_1 = arith.constant 3.200000e+01 : f32
    %3 = vector.broadcast %cst_1 : f32 to vector<16x1xf32>
    %4 = arith.divf %2, %3 : vector<16x1xf32>
    %5 = vector.broadcast %4 : vector<16x1xf32> to vector<16x32xf32>
    %6 = arith.subf %0, %5 : vector<16x32xf32>
    %7 = arith.mulf %6, %6 : vector<16x32xf32>
    %cst_2 = arith.constant dense<0.000000e+00> : vector<16xf32>
    %8 = vector.multi_reduction <add>, %7, %cst_2 [1] : vector<16x32xf32> to vector<16xf32>
    %9 = vector.shape_cast %8 : vector<16xf32> to vector<16x1xf32>
    %cst_3 = arith.constant 3.200000e+01 : f32
    %10 = vector.broadcast %cst_3 : f32 to vector<16x1xf32>
    %11 = arith.divf %9, %10 : vector<16x1xf32>
    %12 = vector.broadcast %4 : vector<16x1xf32> to vector<16x32xf32>
    %13 = arith.subf %0, %12 : vector<16x32xf32>
    %cst_4 = arith.constant 9.99999974E-6 : f32
    %14 = vector.broadcast %cst_4 : f32 to vector<16x1xf32>
    %15 = arith.addf %11, %14 : vector<16x1xf32>
    %16 = math.rsqrt %15 : vector<16x1xf32>
    %17 = vector.broadcast %16 : vector<16x1xf32> to vector<16x32xf32>
    %18 = arith.mulf %13, %17 : vector<16x32xf32>
    %c0_5 = arith.constant 0 : index
    %c0_6 = arith.constant 0 : index
    %19 = vector.load %arg2[%c0_5, %c0_6] : memref<1x32xf32, #tpu.memory_space<vmem>>, vector<1x32xf32>
    %20 = vector.shape_cast %19 : vector<1x32xf32> to vector<32xf32>
    %21 = vector.shape_cast %20 : vector<32xf32> to vector<1x32xf32>
    %22 = vector.broadcast %21 : vector<1x32xf32> to vector<16x32xf32>
    %23 = arith.mulf %18, %22 : vector<16x32xf32>
    %c0_7 = arith.constant 0 : index
    %c0_8 = arith.constant 0 : index
    %24 = vector.load %arg3[%c0_7, %c0_8] : memref<1x32xf32, #tpu.memory_space<vmem>>, vector<1x32xf32>
    %25 = vector.shape_cast %24 : vector<1x32xf32> to vector<32xf32>
    %26 = vector.shape_cast %25 : vector<32xf32> to vector<1x32xf32>
    %27 = vector.broadcast %26 : vector<1x32xf32> to vector<16x32xf32>
    %28 = arith.addf %23, %27 : vector<16x32xf32>
    %c0_9 = arith.constant 0 : index
    %c0_10 = arith.constant 0 : index
    %29 = vector.load %arg4[%c0_9, %c0_10] : memref<32x32xbf16, #tpu.memory_space<vmem>>, vector<32x32xbf16>
    %30 = arith.truncf %28 : vector<16x32xf32> to vector<16x32xbf16>
    %cst_11 = arith.constant dense<0.000000e+00> : vector<16x32xf32>
    %31 = tpu.matmul %30, %29, %cst_11 {dimension_numbers = #tpu.dot_dimension_numbers<[1], [0], [0], [1], [0, 0, 1, 1], [], []>} : vector<16x32xbf16>, vector<32x32xbf16>, vector<16x32xf32> -> vector<16x32xf32>
    %c0_12 = arith.constant 0 : index
    %c0_13 = arith.constant 0 : index
    %32 = vector.load %arg5[%c0_12, %c0_13] : memref<1x32xf32, #tpu.memory_space<vmem>>, vector<1x32xf32>
    %33 = vector.shape_cast %32 : vector<1x32xf32> to vector<32xf32>
    %34 = vector.shape_cast %33 : vector<32xf32> to vector<1x32xf32>
    %35 = vector.broadcast %34 : vector<1x32xf32> to vector<16x32xf32>
    %36 = arith.addf %31, %35 : vector<16x32xf32>
    %37 = arith.truncf %36 : vector<16x32xf32> to vector<16x32xbf16>
    %c0_14 = arith.constant 0 : index
    %c0_15 = arith.constant 0 : index
    %38 = vector.load %arg10[%c0_14, %c0_15] : memref<16x32xbf16, #tpu.memory_space<vmem>>, vector<16x32xbf16>
    tpu.vector_store %arg10[%c0_14, %c0_15], %37 {strides = array<i32>} : memref<16x32xbf16, #tpu.memory_space<vmem>>, vector<16x32xbf16>,
    %c0_16 = arith.constant 0 : index
    %c0_17 = arith.constant 0 : index
    %39 = vector.load %arg6[%c0_16, %c0_17] : memref<32x32xbf16, #tpu.memory_space<vmem>>, vector<32x32xbf16>
    %40 = arith.truncf %28 : vector<16x32xf32> to vector<16x32xbf16>
    %cst_18 = arith.constant dense<0.000000e+00> : vector<16x32xf32>
    %41 = tpu.matmul %40, %39, %cst_18 {dimension_numbers = #tpu.dot_dimension_numbers<[1], [0], [0], [1], [0, 0, 1, 1], [], []>} : vector<16x32xbf16>, vector<32x32xbf16>, vector<16x32xf32> -> vector<16x32xf32>
    %c0_19 = arith.constant 0 : index
    %c0_20 = arith.constant 0 : index
    %42 = vector.load %arg7[%c0_19, %c0_20] : memref<1x32xf32, #tpu.memory_space<vmem>>, vector<1x32xf32>
    %43 = vector.shape_cast %42 : vector<1x32xf32> to vector<32xf32>
    %44 = vector.shape_cast %43 : vector<32xf32> to vector<1x32xf32>
    %45 = vector.broadcast %44 : vector<1x32xf32> to vector<16x32xf32>
    %46 = arith.addf %41, %45 : vector<16x32xf32>
    %47 = arith.truncf %46 : vector<16x32xf32> to vector<16x32xbf16>
    %c0_21 = arith.constant 0 : index
    %c0_22 = arith.constant 0 : index
    %48 = vector.load %arg11[%c0_21, %c0_22] : memref<16x32xbf16, #tpu.memory_space<vmem>>, vector<16x32xbf16>
    tpu.vector_store %arg11[%c0_21, %c0_22], %47 {strides = array<i32>} : memref<16x32xbf16, #tpu.memory_space<vmem>>, vector<16x32xbf16>,
    %c0_23 = arith.constant 0 : index
    %c0_24 = arith.constant 0 : index
    %49 = vector.load %arg8[%c0_23, %c0_24] : memref<32x32xbf16, #tpu.memory_space<vmem>>, vector<32x32xbf16>
    %50 = arith.truncf %28 : vector<16x32xf32> to vector<16x32xbf16>
    %cst_25 = arith.constant dense<0.000000e+00> : vector<16x32xf32>
    %51 = tpu.matmul %50, %49, %cst_25 {dimension_numbers = #tpu.dot_dimension_numbers<[1], [0], [0], [1], [0, 0, 1, 1], [], []>} : vector<16x32xbf16>, vector<32x32xbf16>, vector<16x32xf32> -> vector<16x32xf32>
    %c0_26 = arith.constant 0 : index
    %c0_27 = arith.constant 0 : index
    %52 = vector.load %arg9[%c0_26, %c0_27] : memref<1x32xf32, #tpu.memory_space<vmem>>, vector<1x32xf32>
    %53 = vector.shape_cast %52 : vector<1x32xf32> to vector<32xf32>
    %54 = vector.shape_cast %53 : vector<32xf32> to vector<1x32xf32>
    %55 = vector.broadcast %54 : vector<1x32xf32> to vector<16x32xf32>
    %56 = arith.addf %51, %55 : vector<16x32xf32>
    %57 = arith.truncf %56 : vector<16x32xf32> to vector<16x32xbf16>
    %c0_28 = arith.constant 0 : index
    %c0_29 = arith.constant 0 : index
    %58 = vector.load %arg12[%c0_28, %c0_29] : memref<16x32xbf16, #tpu.memory_space<vmem>>, vector<16x32xbf16>
    tpu.vector_store %arg12[%c0_28, %c0_29], %57 {strides = array<i32>} : memref<16x32xbf16, #tpu.memory_space<vmem>>, vector<16x32xbf16>,
    return
  }
  func.func @transform_0(%arg0: i32) -> (i32, i32) {
    %c0_i32 = arith.constant 0 : i32
    %c0_i32_0 = arith.constant 0 : i32
    return %arg0, %c0_i32 : i32, i32
  }
  func.func @transform_1(%arg0: i32) -> (i32, i32) {
    %c0_i32 = arith.constant 0 : i32
    %c0_i32_0 = arith.constant 0 : i32
    %c0_i32_1 = arith.constant 0 : i32
    return %c0_i32, %c0_i32_0 : i32, i32
  }
  func.func @transform_2(%arg0: i32) -> (i32, i32) {
    %c0_i32 = arith.constant 0 : i32
    %c0_i32_0 = arith.constant 0 : i32
    %c0_i32_1 = arith.constant 0 : i32
    return %c0_i32, %c0_i32_0 : i32, i32
  }
  func.func @transform_3(%arg0: i32) -> (i32, i32) {
    %c0_i32 = arith.constant 0 : i32
    %c0_i32_0 = arith.constant 0 : i32
    %c0_i32_1 = arith.constant 0 : i32
    return %c0_i32, %c0_i32_0 : i32, i32
  }
  func.func @transform_4(%arg0: i32) -> (i32, i32) {
    %c0_i32 = arith.constant 0 : i32
    %c0_i32_0 = arith.constant 0 : i32
    %c0_i32_1 = arith.constant 0 : i32
    return %c0_i32, %c0_i32_0 : i32, i32
  }
  func.func @transform_5(%arg0: i32) -> (i32, i32) {
    %c0_i32 = arith.constant 0 : i32
    %c0_i32_0 = arith.constant 0 : i32
    %c0_i32_1 = arith.constant 0 : i32
    return %c0_i32, %c0_i32_0 : i32, i32
  }
  func.func @transform_6(%arg0: i32) -> (i32, i32) {
    %c0_i32 = arith.constant 0 : i32
    %c0_i32_0 = arith.constant 0 : i32
    %c0_i32_1 = arith.constant 0 : i32
    return %c0_i32, %c0_i32_0 : i32, i32
  }
  func.func @transform_7(%arg0: i32) -> (i32, i32) {
    %c0_i32 = arith.constant 0 : i32
    %c0_i32_0 = arith.constant 0 : i32
    %c0_i32_1 = arith.constant 0 : i32
    return %c0_i32, %c0_i32_0 : i32, i32
  }
  func.func @transform_8(%arg0: i32) -> (i32, i32) {
    %c0_i32 = arith.constant 0 : i32
    %c0_i32_0 = arith.constant 0 : i32
    %c0_i32_1 = arith.constant 0 : i32
    return %c0_i32, %c0_i32_0 : i32, i32
  }
  func.func @transform_9(%arg0: i32) -> (i32, i32) {
    %c0_i32 = arith.constant 0 : i32
    %c0_i32_0 = arith.constant 0 : i32
    return %arg0, %c0_i32 : i32, i32
  }
  func.func @transform_10(%arg0: i32) -> (i32, i32) {
    %c0_i32 = arith.constant 0 : i32
    %c0_i32_0 = arith.constant 0 : i32
    return %arg0, %c0_i32 : i32, i32
  }
  func.func @transform_11(%arg0: i32) -> (i32, i32) {
    %c0_i32 = arith.constant 0 : i32
    %c0_i32_0 = arith.constant 0 : i32
    return %arg0, %c0_i32 : i32, i32
  }
}

</mosaic_0001>

<bundles_post_ra>
// kernel: tpu_custom_call.1
= control target key start
LH: loop header
LB: loop body
LE: loop exit
PB: predicated region body
PF: predicated region fallthrough
CT: control target
= control target key end

     0   :  { %6 = vsyncpa [#allocation3], 0  ;;  %s115_s0 = inlined_call_operand.hbm [shape: f32[8,128], index: 0, kind: input, shape index: {}]   ;;  %s116_s1 = inlined_call_operand.hbm [shape: f32[8,128], index: 1, kind: output, shape index: {}]  }
   0x1   :  { %7 = vsyncpa [#allocation4], 0  ;;  %s13_s8 = sshll.u32 %s115_s0, 4  ;;  %s97_s9 = smov [#allocation2]   ;;  %s14_s8 = int_to_ptr.hbm [resolvable:$true] %s13_s8 }
   0x2   :  { %s15_s10 = sshll.u32 %s97_s9, 4  ;;  %s16_s10 = int_to_ptr.vmem [resolvable:$true] %s15_s10 }
   0x3   :  { %18 = dma.hbm_to_vmem [thread:$0]  %s14_s8, 128, %s16_s10, [#allocation3]  }
   0x4   :  { %93 = dma.done.wait [#allocation3], 128  }
   0x5   :  { %94 = vsyncadd [#allocation3], 4294967168  ;;  %s98_s11 = smov [#allocation5]   ;;  %s33_s15 = sshll.u32 %s116_s1, 4  ;;  %v23_v0 = vld [vmem:[#allocation2] sm:$0xff]  ;;  %s34_s15 = int_to_ptr.hbm [resolvable:$true] %s33_s15 }
   0x6   :  { %s31_s12 = sshll.u32 %s98_s11, 4  ;;  %v24_v1 = vmul.f32 2.0, %v23_v0  ;;  %s32_s12 = int_to_ptr.vmem [resolvable:$true] %s31_s12 }
   0x8   :  { %25 = vst [vmem:[#allocation5] sm:$0xff] %v24_v1 }
   0x9   :  { %36 = dma.vmem_to_hbm [thread:$0]  %s32_s12, 128, %s34_s15, [#allocation4]  }
   0xa   :  { %95 = dma.done.wait [#allocation4], 128  }
   0xb   :  { %96 = vsyncadd [#allocation4], 4294967168 }
   0xc   :  { %41 = vsyncpa [#allocation3], 1 }
   0xd   :  { %42 = vsyncpa [#allocation4], 1 }

// kernel: tpu_custom_call.1
= control target key start
LH: loop header
LB: loop body
LE: loop exit
PB: predicated region body
PF: predicated region fallthrough
CT: control target
= control target key end

     0   :  { %17 = vsyncpa [#allocation3], 0  ;;  %s754_s0 = inlined_call_operand.hbm [shape: f32[16,32], index: 0, kind: input, shape index: {}]   ;;  %s755_s1 = inlined_call_operand.hbm [shape: f32[1,32], index: 1, kind: input, shape index: {}]   ;;  %s756_s2 = inlined_call_operand.vmem [shape: f32[1,32], index: 2, kind: input, shape index: {}]   ;;  %s757_s3 = inlined_call_operand.hbm [shape: bf16[32,32], index: 3, kind: input, shape index: {}]   ;;  %s758_s4 = inlined_call_operand.vmem [shape: f32[1,32], index: 4, kind: input, shape index: {}]   ;;  %s759_s5 = inlined_call_operand.hbm [shape: bf16[32,32], index: 5, kind: input, shape index: {}]   ;;  %s760_s6 = inlined_call_operand.vmem [shape: f32[1,32], index: 6, kind: input, shape index: {}]   ;;  %s761_s7 = inlined_call_operand.hbm [shape: bf16[32,32], index: 7, kind: input, shape index: {}]   ;;  %s762_s8 = inlined_call_operand.vmem [shape: f32[1,32], index: 8, kind: input, shape index: {}]   ;;  %s763_s9 = inlined_call_operand.hbm [shape: bf16[16,32], index: 9, kind: output, shape index: {0}]   ;;  %s764_s10 = inlined_call_operand.hbm [shape: bf16[16,32], index: 10, kind: output, shape index: {1}]   ;;  %s765_s11 = inlined_call_operand.hbm [shape: bf16[16,32], index: 11, kind: output, shape index: {2}]  }
   0x1   :  { %18 = vsyncpa [#allocation6], 0 }
   0x2   :  { %19 = vsyncpa [#allocation9], 0 }
   0x3   :  { %20 = vsyncpa [#allocation4], 0  ;;  %s40_s19 = sshll.u32 %s755_s1, 4  ;;  %s41_s19 = int_to_ptr.hbm [resolvable:$true] %s40_s19 }
   0x4   :  { %21 = vsyncpa [#allocation13], 0  ;;  %s614_s20 = smov [#allocation5]   ;;  %s67_s24 = sshll.u32 %s759_s5, 4  ;;  %s68_s24 = int_to_ptr.hbm [resolvable:$true] %s67_s24 }
   0x5   :  { %s42_s21 = sshll.u32 %s614_s20, 4  ;;  %s615_s25 = smov [#allocation8]   ;;  %s43_s21 = int_to_ptr.vmem [resolvable:$true] %s42_s21 }
   0x6   :  { %45 = dma.hbm_to_vmem [thread:$0]  %s41_s19, 16, %s43_s21, [#allocation6]  }
   0x7   :  { %s69_s26 = sshll.u32 %s615_s25, 4  ;;  %s26_s29 = sshll.u32 %s754_s0, 4  ;;  %s70_s26 = int_to_ptr.vmem [resolvable:$true] %s69_s26  ;;  %s27_s29 = int_to_ptr.hbm [resolvable:$true] %s26_s29 }
   0x8   :  { %s616_s1 = smov 64   ;;  %s617_s30 = smov 4  }
   0x9   :  { %75 = dma.hbm_to_vmem [thread:$0]  %s68_s24, 256, %s70_s26, [#allocation9], %s616_s1, %s616_s1, %s617_s30  }
   0xa   :  { %s618_s12 = smov [#allocation2]   ;;  %s52_s15 = sshll.u32 %s757_s3, 4  ;;  %s53_s15 = int_to_ptr.hbm [resolvable:$true] %s52_s15 }
   0xb   :  { %s28_s13 = sshll.u32 %s618_s12, 4  ;;  %s619_s16 = smov 128   ;;  %s29_s13 = int_to_ptr.vmem [resolvable:$true] %s28_s13 }
   0xc   :  { %s620_s17 = smov 8   ;;  %s621_s0 = smov [#allocation7]  }
   0xd   :  { %34 = dma.hbm_to_vmem [thread:$0]  %s27_s29, 256, %s29_s13, [#allocation3], %s619_s16, %s619_s16, %s620_s17  }
   0xe   :  { %s54_s18 = sshll.u32 %s621_s0, 4  ;;  %s82_s21 = sshll.u32 %s761_s7, 4  ;;  %s55_s18 = int_to_ptr.vmem [resolvable:$true] %s54_s18  ;;  %s83_s21 = int_to_ptr.hbm [resolvable:$true] %s82_s21 }
   0xf   :  { %60 = dma.hbm_to_vmem [thread:$0]  %s53_s15, 256, %s55_s18, [#allocation6], %s616_s1, %s616_s1, %s617_s30  }
  0x10   :  { %s622_s22 = smov [#allocation10]  }
  0x11   :  { %s84_s23 = sshll.u32 %s622_s22, 4  ;;  %s85_s23 = int_to_ptr.vmem [resolvable:$true] %s84_s23 }
  0x12   :  { %90 = dma.hbm_to_vmem [thread:$0]  %s83_s21, 256, %s85_s23, [#allocation9], %s616_s1, %s616_s1, %s617_s30  }
  0x13   :  { %604 = dma.done.wait [#allocation3], 256  }
  0x14   :  { %605 = vsyncadd [#allocation3], 4294967040 }
  0x15   :  { %606 = dma.done.wait [#allocation6], 272  }
  0x16   :  { %607 = vsyncadd [#allocation6], 4294967024 }
  0x17   :  { %608 = dma.done.wait [#allocation9], 512  }
  0x18   :  { %609 = vsyncadd [#allocation9], 4294966784  ;;  %vm116_vm0 = vcmask 261120   ;;  %v114_v0 = vld [vmem:[#allocation2] sm:$0xff]  ;;  %v115_v2 = vld [vmem:[#allocation2 + $0x8] sm:$0xff]  ;;  %v623_v4 = vmov 32.0  }
  0x19   :  { %v117_v1 = vsel %vm116_vm0, %v114_v0, 0.0  ;;  %v120_v3 = vsel %vm116_vm0, %v115_v2, 0.0  ;;  %406 = vrcp.f32 %v623_v4  ;;  %v383_v21 = vld [vmem:[#allocation7 + $0x8] sm:$0xff]  ;;  %v385_v22 = vld [vmem:[#allocation8 + $0x8] sm:$0xff]  ;;  %v382_v25 = vld [vmem:[#allocation7] sm:$0xff]  ;;  %vm220_vm8 = vcmask 257024  }
  0x1a   :  { %118 = vadd.xlane.f32.xlu0 %v117_v1  ;;  %v387_v23 = vld [vmem:[#allocation10 + $0x8] sm:$0xff]  ;;  %210 = vmatpush.bf16.msra.mxu0 %v383_v21  ;;  %v384_v26 = vld [vmem:[#allocation8] sm:$0xff]  ;;  %v386_v28 = vld [vmem:[#allocation10] sm:$0xff]  ;;  %s305_s13 = sshll.u32 %s763_s9, 4  ;;  %s625_s14 = smov [#allocation12]   ;;  %s306_s13 = int_to_ptr.hbm [resolvable:$true] %s305_s13 }
  0x1b   :  { %249 = vmatpush.bf16.msra.mxu1 %v385_v22  ;;  %287 = vmatpush.bf16.msra.mxu2 %v387_v23  ;;  %v401_v46 = vld [vmem:[#allocation5] ss:$0 sm:$0xff]  ;;  %v402_v51 = vld [vmem:[%s756_s2] ss:$0 sm:$0xff]  ;;  %s316_s5 = sshll.u32 %s625_s14, 4  ;;  %s318_s16 = sshll.u32 %s764_s10, 4  ;;  %s317_s5 = int_to_ptr.vmem [resolvable:$true] %s316_s5  ;;  %s319_s16 = int_to_ptr.hbm [resolvable:$true] %s318_s16 }
  0x1c   :  { %v403_v56 = vld [vmem:[%s758_s4] ss:$0 sm:$0xff]  ;;  %s624_s4 = smov [#allocation11]   ;;  %s626_s9 = smov [#allocation14]  }
  0x1d   :  { %v404_v57 = vld [vmem:[%s760_s6] ss:$0 sm:$0xff]  ;;  %s303_s6 = sshll.u32 %s624_s4, 4  ;;  %s329_s17 = sshll.u32 %s626_s9, 4  ;;  %s304_s6 = int_to_ptr.vmem [resolvable:$true] %s303_s6  ;;  %s330_s17 = int_to_ptr.vmem [resolvable:$true] %s329_s17 }
  0x1e   :  { %211 = vmatpush.bf16.msra.mxu0 %v382_v25  ;;  %s331_s19 = sshll.u32 %s765_s11, 4  ;;  %s332_s19 = int_to_ptr.hbm [resolvable:$true] %s331_s19 }
  0x1f   :  { %v407_v5 = vpop.eup %406  ;;  %250 = vmatpush.bf16.msra.mxu1 %v384_v26  ;;  %288 = vmatpush.bf16.msra.mxu2 %v386_v28 }
  0x20   :  { %v124_v6 = vmul.f32 32.0, %v407_v5  ;;  %vm128_vm1 = vweird.f32 %v407_v5 }
  0x22   :  { %121 = vadd.xlane.f32.xlu0 %v120_v3  ;;  %v125_v7 = vsub.f32 1.0, %v124_v6 }
  0x24   :  { %v126_v8 = vmul.f32 %v407_v5, %v125_v7 }
  0x26   :  { %v127_v9 = vadd.f32 %v407_v5, %v126_v8 }
  0x28   :  { %v129_v10 = vsel %vm128_vm1, %v407_v5, %v127_v9 }
  0x8d   :  { %v119_v11 = vpop.xlane.xlu0 %118 }
  0x8e   :  { %v130_v12 = vmul.f32 %v129_v10, %v119_v11 }
  0x90   :  { %v132_v13 = vsub.f32 %v114_v0, %v130_v12  ;;  %v405_v0 = vld [vmem:[%s762_s8] ss:$0 sm:$0xff] }
  0x92   :  { %v134_v14 = vmul.f32 %v132_v13, %v132_v13 }
  0x94   :  { %v136_v15 = vsel %vm116_vm0, %v134_v14, 0.0 }
  0x95   :  { %137 = vadd.xlane.f32.xlu1 %v136_v15  ;;  %v122_v16 = vpop.xlane.xlu0 %121 }
  0x96   :  { %v131_v17 = vmul.f32 %v129_v10, %v122_v16 }
  0x98   :  { %v133_v18 = vsub.f32 %v115_v2, %v131_v17 }
  0x9a   :  { %v135_v19 = vmul.f32 %v133_v18, %v133_v18 }
  0x9c   :  { %v139_v20 = vsel %vm116_vm0, %v135_v19, 0.0 }
  0x9d   :  { %140 = vadd.xlane.f32.xlu1 %v139_v20 }
 0x108   :  { %v138_v24 = vpop.xlane.xlu1 %137 }
 0x109   :  { %v142_v27 = vmul.f32 %v138_v24, %v129_v10 }
 0x10b   :  { %v144_v29 = vadd.f32 1e-05, %v142_v27 }
 0x10d   :  { %408 = vrsqrt.f32 %v144_v29  ;;  %vm152_vm3 = vweird.f32 %v144_v29 }
 0x110   :  { %v141_v30 = vpop.xlane.xlu1 %140 }
 0x111   :  { %v143_v31 = vmul.f32 %v141_v30, %v129_v10 }
 0x113   :  { %v409_v32 = vpop.eup %408  ;;  %v145_v33 = vadd.f32 1e-05, %v143_v31 }
 0x114   :  { %v147_v34 = vmul.f32 %v409_v32, %v144_v29  ;;  %vm153_vm2 = vweird.f32 %v409_v32 }
 0x115   :  { %410 = vrsqrt.f32 %v145_v33  ;;  %vm154_vm4 = vmor %vm152_vm3, %vm153_vm2  ;;  %vm162_vm6 = vweird.f32 %v145_v33 }
 0x116   :  { %v148_v35 = vmul.f32 %v409_v32, %v147_v34 }
 0x118   :  { %v149_v36 = vmul.f32 0.5, %v148_v35 }
 0x11a   :  { %v150_v37 = vsub.f32 1.5, %v149_v36 }
 0x11b   :  { %v411_v38 = vpop.eup %410 }
 0x11c   :  { %v151_v39 = vmul.f32 %v409_v32, %v150_v37  ;;  %v157_v40 = vmul.f32 %v411_v38, %v145_v33  ;;  %vm163_vm5 = vweird.f32 %v411_v38 }
 0x11d   :  { %vm164_vm7 = vmor %vm162_vm6, %vm163_vm5 }
 0x11e   :  { %v158_v41 = vmul.f32 %v411_v38, %v157_v40  ;;  %v155_v42 = vsel %vm154_vm4, %v409_v32, %v151_v39 }
 0x11f   :  { %v166_v45 = vmul.f32 %v155_v42, %v132_v13 }
 0x120   :  { %v159_v43 = vmul.f32 0.5, %v158_v41 }
 0x121   :  { %v172_v50 = vmul.f32 %v401_v46, %v166_v45 }
 0x122   :  { %v160_v44 = vsub.f32 1.5, %v159_v43 }
 0x123   :  { %v178_v53 = vadd.f32 %v402_v51, %v172_v50 }
 0x124   :  { %v161_v47 = vmul.f32 %v411_v38, %v160_v44 }
 0x126   :  { %v165_v48 = vsel %vm164_vm7, %v411_v38, %v161_v47 }
 0x127   :  { %v167_v49 = vmul.f32 %v165_v48, %v133_v18 }
 0x129   :  { %v173_v52 = vmul.f32 %v401_v46, %v167_v49 }
 0x12b   :  { %v179_v54 = vadd.f32 %v402_v51, %v173_v52 }
 0x12d   :  { %v184_v55 = vpack.c.bf16 %v179_v54, %v178_v53 }
 0x12f   :  { %363 = vmatmul.msk.bf16.vlgmr.msra.gmra.mxu0 %vm116_vm0, %v184_v55  ;;  %372 = vmatmul.msk.bf16.vlgmr.msra.gmra.mxu1 %vm116_vm0, %v184_v55 }
 0x130   :  { %381 = vmatmul.msk.bf16.vlgmr.msra.gmra.mxu2 %vm116_vm0, %v184_v55 }
 0x1ac   :  { %v213_v58 = vpop.f32.mrf.mxu0  ;;  %v252_v59 = vpop.f32.mrf.mxu1 }
 0x1ad   :  { %v214_v60 = vadd.f32 %v403_v56, %v213_v58  ;;  %v253_v61 = vadd.f32 %v404_v57, %v252_v59 }
 0x1af   :  { %v218_v62 = vpack.c.bf16 %v214_v60, %v214_v60  ;;  %v257_v63 = vpack.c.bf16 %v253_v61, %v253_v61 }
 0x1b1   :  { %221 = vst.msk [vmem:[#allocation11] sm:$0xf] %vm220_vm8, %v218_v62 }
 0x1b2   :  { %259 = vst.msk [vmem:[#allocation12] sm:$0xf] %vm220_vm8, %v257_v63 }
 0x1b3   :  { %v290_v1 = vpop.f32.mrf.mxu2 }
 0x1b4   :  { %v291_v2 = vadd.f32 %v405_v0, %v290_v1  ;;  %v215_v3 = vpop.f32.mrf.mxu0  ;;  %v254_v4 = vpop.f32.mrf.mxu1 }
 0x1b5   :  { %v216_v5 = vadd.f32 %v403_v56, %v215_v3  ;;  %v255_v6 = vadd.f32 %v404_v57, %v254_v4 }
 0x1b6   :  { %v295_v7 = vpack.c.bf16 %v291_v2, %v291_v2 }
 0x1b7   :  { %v219_v8 = vpack.c.bf16 %v216_v5, %v216_v5  ;;  %v258_v9 = vpack.c.bf16 %v255_v6, %v255_v6 }
 0x1b8   :  { %297 = vst.msk [vmem:[#allocation14] sm:$0xf] %vm220_vm8, %v295_v7 }
 0x1b9   :  { %222 = vst.msk [vmem:[#allocation11 + $0x4] sm:$0xf] %vm220_vm8, %v219_v8 }
 0x1ba   :  { %260 = vst.msk [vmem:[#allocation12 + $0x4] sm:$0xf] %vm220_vm8, %v258_v9  ;;  %311 = dma.vmem_to_hbm [thread:$0]  %s304_s6, 128, %s306_s13, [#allocation4], %s616_s1, %s616_s1, %s617_s30  }
 0x1bb   :  { %v292_v10 = vpop.f32.mrf.mxu2  ;;  %324 = dma.vmem_to_hbm [thread:$0]  %s317_s5, 128, %s319_s16, [#allocation13], %s616_s1, %s616_s1, %s617_s30  }
 0x1bc   :  { %v293_v11 = vadd.f32 %v405_v0, %v292_v10 }
 0x1be   :  { %v296_v12 = vpack.c.bf16 %v293_v11, %v293_v11 }
 0x1c0   :  { %298 = vst.msk [vmem:[#allocation14 + $0x4] sm:$0xf] %vm220_vm8, %v296_v12 }
 0x1c1   :  { %337 = dma.vmem_to_hbm [thread:$0]  %s330_s17, 128, %s332_s19, [#allocation13], %s616_s1, %s616_s1, %s617_s30  }
 0x1c2   :  { %610 = dma.done.wait [#allocation4], 128  }
 0x1c3   :  { %611 = vsyncadd [#allocation4], 4294967168 }
 0x1c4   :  { %612 = dma.done.wait [#allocation13], 256  }
 0x1c5   :  { %613 = vsyncadd [#allocation13], 4294967040 }
 0x1c6   :  { %350 = vsyncpa [#allocation3], 1 }
 0x1c7   :  { %351 = vsyncpa [#allocation6], 1 }
 0x1c8   :  { %352 = vsyncpa [#allocation9], 1 }
 0x1c9   :  { %353 = vsyncpa [#allocation4], 1 }
 0x1ca   :  { %354 = vsyncpa [#allocation13], 1 }

</bundles_post_ra>
